<compile_context>
chip_gen: v7x
topology: tpu7x:2x2x1
jax: 0.10.0
libtpu: 0.0.40
codegen_flags: <defaults>
</compile_context>

<pallas_src>
import jax
import jax.numpy as jnp
from jax.experimental import pallas as pl
from jax.experimental.pallas import tpu as pltpu


def _round_up(x, m):
    return ((x + m - 1) // m) * m


def _tpu_vmem_capacity_bytes():
    try:
        return int(pltpu.get_tpu_info().vmem_capacity_bytes)
    except Exception:
        return 64 << 20  # conservative fallback (v7x per-TensorCore VMEM)


def _default_config():
    cap = _tpu_vmem_capacity_bytes()
    if cap >= (100 << 20):          # v5e / v6e: 128 MiB physical VMEM
        return 1024, 1024, 512, cap
    else:                           # v7x: 64 MiB per TensorCore
        return 512, 512, 512, cap


def _make_linear_kernel(K, tile_k, acc_in_out):
    """Build the kernel body.  K, tile_k are static; k_rem != 0 enables the
    in-kernel mask of the ragged last K block (replaces wrapper-side jnp.pad)."""
    k_rem = K % tile_k

    def _operands(x_ref, w_ref, k):
        x = x_ref[...]
        w = w_ref[...]
        if k_rem:
            # Columns >= (K - k*tile_k) of the last K block are stale VMEM;
            # zero them on BOTH operands so garbage (possibly NaN) never
            # reaches the accumulator.  For non-final blocks the limit is
            # >= tile_k so the select is a no-op values-wise.
            lim = K - k * tile_k
            x = jnp.where(
                jax.lax.broadcasted_iota(jnp.int32, x.shape, 1) < lim, x, 0)
            w = jnp.where(
                jax.lax.broadcasted_iota(jnp.int32, w.shape, 1) < lim, w, 0)
        return x, w

    def _partial(x, w):
        # x[m, k] * w[n, k] summed over k  ==  x @ W^T on the MXU
        # (same contraction pattern as flash-attention q @ k^T; no transpose copy).
        return jax.lax.dot_general(
            x, w, dimension_numbers=(((1,), (1,)), ((), ())),
            preferred_element_type=jnp.float32)

    if acc_in_out:
        # float32 output: accumulate directly in the VMEM-resident output block.
        def kernel(x_ref, w_ref, b_ref, o_ref):
            k = pl.program_id(2)
            x, w = _operands(x_ref, w_ref, k)
            part = _partial(x, w)

            @pl.when(k == 0)
            def _():
                o_ref[...] = part + b_ref[...]

            @pl.when(k != 0)
            def _():
                o_ref[...] += part
        return kernel

    # Low-precision output: f32 scratch accumulator + cast at the last K step.
    def kernel(x_ref, w_ref, b_ref, o_ref, acc_ref):
        k = pl.program_id(2)
        x, w = _operands(x_ref, w_ref, k)
        part = _partial(x, w)

        @pl.when(k == 0)
        def _():
            acc_ref[...] = part

        @pl.when(k != 0)
        def _():
            acc_ref[...] += part

        @pl.when(k == pl.num_programs(2) - 1)
        def _():
            o_ref[...] = (acc_ref[...] + b_ref[...]).astype(o_ref.dtype)
    return kernel


def linear_forward(x, weight, bias, *, tile_m=None, tile_n=None, tile_k=None,
                   force_pallas=False):
    """y = x @ weight.T + bias  (torch.nn.Linear semantics).

    x:      [..., K]
    weight: [N, K]   (PyTorch layout, used as-is — never transposed in HBM)
    bias:   [N]
    returns [..., N] in x.dtype
    """
    *lead, K = x.shape
    N, K2 = weight.shape
    assert K == K2, "input_dim mismatch"
    assert bias.shape == (N,)
    out_dtype = x.dtype

    x2 = x.reshape(-1, K)
    M = x2.shape[0]

    # ---- small-problem fast path: below ~one MXU tile of work the pallas_call
    # fixed cost + pad/slice dominate; plain XLA dot is strictly better. ----
    if not force_pallas and M <= 256 and N <= 256 and K <= 512:
        y = jax.lax.dot_general(
            x2, weight, dimension_numbers=(((1,), (1,)), ((), ())),
            preferred_element_type=jnp.float32)
        y = (y + bias.astype(jnp.float32)).astype(out_dtype)
        return y.reshape(*lead, N)

    # ---- generation-aware tile defaults / VMEM budget ----
    dtm, dtn, dtk, vmem_cap = _default_config()
    tile_m = dtm if tile_m is None else tile_m
    tile_n = dtn if tile_n is None else tile_n
    tile_k = dtk if tile_k is None else tile_k
    assert tile_m % 8 == 0 and tile_n % 128 == 0 and tile_k % 128 == 0

    # N padded only to a lane-dense multiple of 128 (NOT to a tile_n multiple).
    n_pad = _round_up(N, 128)
    tile_m = min(tile_m, _round_up(M, 8))
    tile_n = min(tile_n, n_pad)
    if K <= tile_k:
        tile_k = K                      # single K block, exact extent, no mask

    grid_m = pl.cdiv(M, tile_m)
    grid_n = pl.cdiv(n_pad, tile_n)
    grid_k = pl.cdiv(K, tile_k)

    # v7x megacore: guarantee >= 2 independent (i, j) tiles when there is
    # enough work so both TensorCores get a share of the parallel axes.
    if grid_m * grid_n == 1 and M >= 16 and M * n_pad >= 2 * 128 * 128:
        tile_m = _round_up(pl.cdiv(M, 2), 8)
        grid_m = pl.cdiv(M, tile_m)

    # ---- layout glue (only when N is not already a multiple of 128) ----
    if n_pad != N:
        weight = jnp.pad(weight, ((0, n_pad - N), (0, 0)))
        bias = jnp.pad(bias, (0, n_pad - N))
    b2d = bias.astype(jnp.float32).reshape(1, n_pad)

    acc_in_out = (out_dtype == jnp.float32)
    kernel = _make_linear_kernel(K, tile_k, acc_in_out)
    scratch = () if acc_in_out else (pltpu.VMEM((tile_m, tile_n), jnp.float32),)

    # VMEM footprint: double-buffered tiles (+ optional accumulator) + headroom,
    # capped at 3/4 of the chip's physical VMEM (64 MiB on v7x, 128 MiB v5e/v6e).
    xb = jnp.dtype(x2.dtype).itemsize
    wb = jnp.dtype(weight.dtype).itemsize
    ob = jnp.dtype(out_dtype).itemsize
    need = 2 * (tile_m * tile_k * xb + tile_n * tile_k * wb
                + tile_m * tile_n * ob + tile_n * 4)
    if not acc_in_out:
        need += tile_m * tile_n * 4
    vmem_limit = int(min(0.75 * vmem_cap, max(2 * need, 64 << 20)))

    out = pl.pallas_call(
        kernel,
        out_shape=jax.ShapeDtypeStruct((M, n_pad), out_dtype),
        grid=(grid_m, grid_n, grid_k),
        in_specs=[
            pl.BlockSpec((tile_m, tile_k), lambda i, j, k: (i, k)),   # x
            pl.BlockSpec((tile_n, tile_k), lambda i, j, k: (j, k)),   # weight [N, K]
            pl.BlockSpec((1, tile_n), lambda i, j, k: (0, j)),        # bias
        ],
        out_specs=pl.BlockSpec((tile_m, tile_n), lambda i, j, k: (i, j)),
        scratch_shapes=scratch,
        compiler_params=pltpu.CompilerParams(
            # M and N are independent (megacore-shardable); K is the reduction.
            dimension_semantics=("parallel", "parallel", "arbitrary"),
            vmem_limit_bytes=vmem_limit,
        ),
    )(x2, weight, b2d)

    out = out[:, :N] if n_pad != N else out
    return out.reshape(*lead, N)


if __name__ == "__main__":
    # --- 1) Tiny shapes matching LinearRegression(input_dim=32, output_dim=16),
    #        forced through the Pallas kernel. ---
    batch, input_dim, output_dim = 8, 32, 16
    key = jax.random.PRNGKey(0)
    kx, kw, kb = jax.random.split(key, 3)

    x = jax.random.normal(kx, (batch, input_dim), dtype=jnp.float32)
    bound = 1.0 / (input_dim ** 0.5)
    weight = jax.random.uniform(kw, (output_dim, input_dim),
                                minval=-bound, maxval=bound, dtype=jnp.float32)
    bias = jax.random.uniform(kb, (output_dim,),
                              minval=-bound, maxval=bound, dtype=jnp.float32)

    y = linear_forward(x, weight, bias, force_pallas=True)
    jax.block_until_ready(y)
    y_ref = x @ weight.T + bias
    assert y.shape == (batch, output_dim)
    assert jnp.allclose(y, y_ref, atol=1e-2, rtol=1e-2)

    # Fast path (same shapes, no Pallas) must agree too.
    y_fast = linear_forward(x, weight, bias)
    assert jnp.allclose(y_fast, y_ref, atol=1e-2, rtol=1e-2)

    # --- 2) Moderate case: grid_k = 3 with a ragged last K block (in-kernel
    #        masking), N = 384 (no N padding), and the megacore M split. ---
    M2, K2, N2 = 256, 1056, 384
    ks = jax.random.split(jax.random.PRNGKey(1), 3)
    x2 = jax.random.normal(ks[0], (M2, K2), dtype=jnp.float32)
    w2 = jax.random.normal(ks[1], (N2, K2), dtype=jnp.float32) * (1.0 / (K2 ** 0.5))
    b2 = jax.random.normal(ks[2], (N2,), dtype=jnp.float32)

    y2 = linear_forward(x2, w2, b2)
    jax.block_until_ready(y2)
    y2_ref = jax.lax.dot_general(
        x2, w2, dimension_numbers=(((1,), (1,)), ((), ())),
        precision=jax.lax.Precision.HIGHEST) + b2
    assert y2.shape == (M2, N2)
    assert jnp.allclose(y2, y2_ref, atol=2e-2, rtol=2e-2)

    # --- 3) bfloat16 case: exercises the scratch-accumulator / cast variant. ---
    M3, K3, N3 = 64, 160, 48
    ks3 = jax.random.split(jax.random.PRNGKey(2), 3)
    x3 = jax.random.normal(ks3[0], (M3, K3), dtype=jnp.float32).astype(jnp.bfloat16)
    w3 = (jax.random.normal(ks3[1], (N3, K3), dtype=jnp.float32)
          * (1.0 / (K3 ** 0.5))).astype(jnp.bfloat16)
    b3 = jax.random.normal(ks3[2], (N3,), dtype=jnp.float32).astype(jnp.bfloat16)

    y3 = linear_forward(x3, w3, b3, force_pallas=True)
    jax.block_until_ready(y3)
    y3_ref = (x3.astype(jnp.float32) @ w3.astype(jnp.float32).T
              + b3.astype(jnp.float32))
    assert y3.shape == (M3, N3)
    assert jnp.allclose(y3.astype(jnp.float32), y3_ref, atol=1e-1, rtol=5e-2)

    print("KERNEL_OK")
</pallas_src>

<mosaic_0001>
module attributes {stable_mosaic.version = 11 : i64} {
  func.func @kernel(%arg0: i32, %arg1: i32, %arg2: i32, %arg3: memref<8x32xf32, #tpu.memory_space<vmem>>, %arg4: memref<128x32xf32, #tpu.memory_space<vmem>>, %arg5: memref<1x128xf32, #tpu.memory_space<vmem>>, %arg6: memref<8x128xf32, #tpu.memory_space<vmem>>) attributes {dimension_semantics = [#tpu.dimension_semantics<parallel>, #tpu.dimension_semantics<parallel>, #tpu.dimension_semantics<arbitrary>], iteration_bounds = array<i64: 1, 1, 1>, scalar_prefetch = 0 : i64, scratch_operands = 0 : i64, tpu.core_type = #tpu.core_type<tc>, window_params = [{transform_indices = @transform_0, window_bounds = array<i64: 8, 32>}, {transform_indices = @transform_1, window_bounds = array<i64: 128, 32>}, {transform_indices = @transform_2, window_bounds = array<i64: 1, 128>}, {transform_indices = @transform_3, window_bounds = array<i64: 8, 128>}]} {
    %c0 = arith.constant 0 : index
    %c0_0 = arith.constant 0 : index
    %0 = vector.load %arg3[%c0, %c0_0] : memref<8x32xf32, #tpu.memory_space<vmem>>, vector<8x32xf32>
    %c0_1 = arith.constant 0 : index
    %c0_2 = arith.constant 0 : index
    %1 = vector.load %arg4[%c0_1, %c0_2] : memref<128x32xf32, #tpu.memory_space<vmem>>, vector<128x32xf32>
    %cst = arith.constant dense<0.000000e+00> : vector<8x128xf32>
    %2 = tpu.matmul %0, %1, %cst {dimension_numbers = #tpu.dot_dimension_numbers<[1], [1], [0], [0], [0, 0, 1, 0], [], []>} : vector<8x32xf32>, vector<128x32xf32>, vector<8x128xf32> -> vector<8x128xf32>
    %c0_i32 = arith.constant 0 : i32
    %3 = arith.cmpi eq, %arg2, %c0_i32 : i32
    %4 = arith.extui %3 : i1 to i32
    %c0_i32_3 = arith.constant 0 : i32
    %5 = arith.cmpi ne, %4, %c0_i32_3 : i32
    scf.if %5 {
      %c0_6 = arith.constant 0 : index
      %c0_7 = arith.constant 0 : index
      %9 = vector.load %arg5[%c0_6, %c0_7] : memref<1x128xf32, #tpu.memory_space<vmem>>, vector<1x128xf32>
      %10 = vector.broadcast %9 : vector<1x128xf32> to vector<8x128xf32>
      %11 = arith.addf %2, %10 : vector<8x128xf32>
      %c0_8 = arith.constant 0 : index
      %c0_9 = arith.constant 0 : index
      %12 = vector.load %arg6[%c0_8, %c0_9] : memref<8x128xf32, #tpu.memory_space<vmem>>, vector<8x128xf32>
      tpu.vector_store %arg6[%c0_8, %c0_9], %11 {strides = array<i32>} : memref<8x128xf32, #tpu.memory_space<vmem>>, vector<8x128xf32>,
    } else {
    }
    %c0_i32_4 = arith.constant 0 : i32
    %6 = arith.cmpi ne, %arg2, %c0_i32_4 : i32
    %7 = arith.extui %6 : i1 to i32
    %c0_i32_5 = arith.constant 0 : i32
    %8 = arith.cmpi ne, %7, %c0_i32_5 : i32
    scf.if %8 {
      %c0_6 = arith.constant 0 : index
      %c0_7 = arith.constant 0 : index
      %9 = vector.load %arg6[%c0_6, %c0_7] : memref<8x128xf32, #tpu.memory_space<vmem>>, vector<8x128xf32>
      %10 = arith.addf %9, %2 : vector<8x128xf32>
      %c0_8 = arith.constant 0 : index
      %c0_9 = arith.constant 0 : index
      %11 = vector.load %arg6[%c0_8, %c0_9] : memref<8x128xf32, #tpu.memory_space<vmem>>, vector<8x128xf32>
      tpu.vector_store %arg6[%c0_8, %c0_9], %10 {strides = array<i32>} : memref<8x128xf32, #tpu.memory_space<vmem>>, vector<8x128xf32>,
    } else {
    }
    return
  }
  func.func @transform_0(%arg0: i32, %arg1: i32, %arg2: i32) -> (i32, i32) {
    %c0_i32 = arith.constant 0 : i32
    return %arg0, %arg2 : i32, i32
  }
  func.func @transform_1(%arg0: i32, %arg1: i32, %arg2: i32) -> (i32, i32) {
    %c0_i32 = arith.constant 0 : i32
    return %arg1, %arg2 : i32, i32
  }
  func.func @transform_2(%arg0: i32, %arg1: i32, %arg2: i32) -> (i32, i32) {
    %c0_i32 = arith.constant 0 : i32
    %c0_i32_0 = arith.constant 0 : i32
    return %c0_i32, %arg1 : i32, i32
  }
  func.func @transform_3(%arg0: i32, %arg1: i32, %arg2: i32) -> (i32, i32) {
    %c0_i32 = arith.constant 0 : i32
    return %arg0, %arg1 : i32, i32
  }
}

</mosaic_0001>

<bundles_post_ra>
// kernel: tpu_custom_call.1
= control target key start
LH: loop header
LB: loop body
LE: loop exit
PB: predicated region body
PF: predicated region fallthrough
CT: control target
= control target key end

     0   :  { %vm32_vm0 = vcmask 261120   ;;  %v318_v2 = vmov 0.0|0.0   ;;  %vm319_vm2 = vmmov 0   ;;  %v320_v5 = vmov 0.0   ;;  %s431_s0 = inlined_call_operand.vmem [shape: f32[8,32], index: 0, kind: input, shape index: {}]   ;;  %s432_s1 = inlined_call_operand.vmem [shape: f32[128,32], index: 1, kind: input, shape index: {}]   ;;  %s433_s2 = inlined_call_operand.vmem [shape: f32[1,128], index: 2, kind: input, shape index: {}]   ;;  %s434_s3 = inlined_call_operand.hbm [shape: f32[8,128], index: 3, kind: output, shape index: {}]  }
   0x1   :  { %v16_v0 = vld [vmem:[%s432_s1] sm:$0xff]  ;;  %v17_v1 = vld [vmem:[%s432_s1 + $0x8] sm:$0xff]  ;;  %258 = vmatprep.subr.bf16.mxu0 %v318_v2  ;;  %vm350_vm1 = vmpackc.low %vm32_vm0, %vm32_vm0  ;;  %255 = vmatprep.mubr.msk.f32.mxu0 %vm319_vm2, %v320_v5 }
   0x2   :  { %v259_v3 = vpack.c.bf16 %v17_v1, %v16_v0  ;;  %v18_v6 = vld [vmem:[%s432_s1 + $0x10] sm:$0xff]  ;;  %v19_v7 = vld [vmem:[%s432_s1 + $0x18] sm:$0xff] }
   0x4   :  { %261 = vmatpush3.bf16.xpose.msk.msra.mxu0 %vm350_vm1, %v259_v3 }
   0x5   :  { %262 = vmatprep.subr.bf16.mxu0 %v318_v2 }
   0x6   :  { %8 = vsyncpa [#allocation3], 0  ;;  %v263_v8 = vpack.c.bf16 %v19_v7, %v18_v6  ;;  %v20_v9 = vld [vmem:[%s432_s1 + $0x20] sm:$0xff]  ;;  %v21_v10 = vld [vmem:[%s432_s1 + $0x28] sm:$0xff]  ;;  %s321_s21 = smov [#allocation2]  }
   0x7   :  { %v267_v11 = vpack.c.bf16 %v21_v10, %v20_v9  ;;  %v22_v12 = vld [vmem:[%s432_s1 + $0x30] sm:$0xff]  ;;  %v23_v13 = vld [vmem:[%s432_s1 + $0x38] sm:$0xff]  ;;  %v24_v15 = vld [vmem:[%s432_s1 + $0x40] sm:$0xff]  ;;  %s180_s22 = sshll.u32 %s321_s21, 4  ;;  %s181_s22 = int_to_ptr.vmem [resolvable:$true] %s180_s22 }
   0x8   :  { %v271_v14 = vpack.c.bf16 %v23_v13, %v22_v12  ;;  %v25_v16 = vld [vmem:[%s432_s1 + $0x48] sm:$0xff]  ;;  %v26_v18 = vld [vmem:[%s432_s1 + $0x50] sm:$0xff]  ;;  %v27_v19 = vld [vmem:[%s432_s1 + $0x58] sm:$0xff]  ;;  %p299_p1 = scmp.lt.s32.totalorder %s181_s22, %s181_s22 }
   0x9   :  { %v275_v17 = vpack.c.bf16 %v25_v16, %v24_v15  ;;  %v279_v20 = vpack.c.bf16 %v27_v19, %v26_v18  ;;  %v28_v21 = vld [vmem:[%s432_s1 + $0x60] sm:$0xff]  ;;  %v29_v22 = vld [vmem:[%s432_s1 + $0x68] sm:$0xff]  ;;  %v30_v24 = vld [vmem:[%s432_s1 + $0x70] sm:$0xff] }
   0xa   :  { %v283_v23 = vpack.c.bf16 %v29_v22, %v28_v21  ;;  %v31_v25 = vld [vmem:[%s432_s1 + $0x78] sm:$0xff]  ;;  %v15_v27 = vld [vmem:[%s431_s0] sm:$0xff]  ;;  %s294_s1 = scalar_lea.vmem %s181_s22, 128 }
   0xb   :  { %v287_v26 = vpack.c.bf16 %v31_v25, %v30_v24  ;;  %v205_v28 = vld [vmem:[%s433_s2] ss:$0 sm:$0xff]  ;;  %p295_p0 = scmp.ne.s32.totalorder %s181_s22, %s294_s1  ;;  %p300_p2 = scmp.lt.s32.totalorder %s294_s1, %s294_s1 }
   0xc   :  { %265 = vmatpush3.bf16.xpose.msk.msra.mxu0 %vm350_vm1, %v263_v8 }
   0xd   :  { %266 = vmatprep.subr.bf16.mxu0 %v318_v2  ;;  %p301_p3 = por %p300_p2, %p299_p1 }
   0xf   :  { %p302_p4 = pnand %p301_p3, %p295_p0 }
  0x14   :  { %269 = vmatpush3.bf16.xpose.msk.msra.mxu0 %vm350_vm1, %v267_v11 }
  0x15   :  { %270 = vmatprep.subr.bf16.mxu0 %v318_v2 }
  0x1c   :  { %273 = vmatpush3.bf16.xpose.msk.msra.mxu0 %vm350_vm1, %v271_v14 }
  0x1d   :  { %274 = vmatprep.subr.bf16.mxu0 %v318_v2 }
  0x24   :  { %277 = vmatpush3.bf16.xpose.msk.msra.mxu0 %vm350_vm1, %v275_v17 }
  0x25   :  { %278 = vmatprep.subr.bf16.mxu0 %v318_v2 }
  0x2c   :  { %281 = vmatpush3.bf16.xpose.msk.msra.mxu0 %vm350_vm1, %v279_v20 }
  0x2d   :  { %282 = vmatprep.subr.bf16.mxu0 %v318_v2 }
  0x34   :  { %285 = vmatpush3.bf16.xpose.msk.msra.mxu0 %vm350_vm1, %v283_v23 }
  0x35   :  { %286 = vmatprep.subr.bf16.mxu0 %v318_v2 }
  0x3c   :  { %289 = vmatpush3.bf16.xpose.msk.msra.mxu0 %vm350_vm1, %v287_v26 }
  0x43   :  { %256 = vmatmul.mubr.msk.f32.vlgmr.msra.gmra.mrb[0].mxu0 %vm32_vm0, %v15_v27 }
 0x116   :  { %v150_v29 = vpop.f32.mrb[0].mxu0 }
 0x117   :  { %v165_v30 = vadd.f32 %v205_v28, %v150_v29  ;;  %v257_v31 = vpop.f32.mrb[1].mxu0 }
 0x119   :  { %166 = vst [vmem:[#allocation2] sm:$0xff] %v165_v30 }
 0x11a   :  { %305 = shalt.err (!%p302_p4)
}
 0x11b   :  { %s306_s24 = scalar_lea.hbm %s434_s3, 128 }
 0x11c   :  { %p307_p5 = scmp.ne.s32.totalorder %s434_s3, %s306_s24  ;;  %p310_p6 = scmp.lt.u32.totalorder %s306_s24, %s434_s3 }
 0x11e   :  { %p312_p7 = pnand %p310_p6, %p307_p5 }
 0x120   :  { %315 = shalt.err (!%p312_p7)
}
 0x121   :  { %183 = dma.vmem_to_hbm [thread:$0]  %s181_s22, 128, %s434_s3, [#allocation3]  }
 0x122   :  { %316 = dma.done.wait [#allocation3], 128  }
 0x123   :  { %317 = vsyncadd [#allocation3], 4294967168 }
 0x124   :  { %187 = vsyncpa [#allocation3], 1 }

</bundles_post_ra>
